<compile_context>
chip_gen: v6e
topology: v6e:2x2x1
jax: 0.10.0
libtpu: 0.0.40
codegen_flags: <defaults>
</compile_context>

<pallas_src>
import numpy as np
import jax
import jax.numpy as jnp
from jax import lax
from jax.experimental import pallas as pl
from jax.experimental.pallas import tpu as pltpu

C = 3            # channels (in == out for both convs)
D = H = W = 4    # spatial extents
K = 3            # kernel size
P = D * H * W    # 64 spatial positions per channel
F = C * P        # 192 flat lanes
EPS = 1e-5


def _shift3d():
    """S3[t,q,p]=1 iff output p=(d,h,w) reads input q=(d+kd-1,h+kh-1,w+kw-1),
    tap t=(kd,kh,kw), padding=1 (zero outside)."""
    S = np.zeros((K ** 3, P, P), np.float32)
    for kd in range(K):
        for kh in range(K):
            for kw in range(K):
                t = (kd * K + kh) * K + kw
                for d in range(D):
                    for h in range(H):
                        for w in range(W):
                            dd, hh, ww = d + kd - 1, h + kh - 1, w + kw - 1
                            if 0 <= dd < D and 0 <= hh < H and 0 <= ww < W:
                                S[t, (dd * H + hh) * W + ww, (d * H + h) * W + w] = 1.0
    return S


def _shift2d():
    """S2[t,q,p]=1 iff output p=(d,h,w) reads input q=(d,h+kh-1,w+kw-1),
    tap t=(kh,kw), padding=1, depth preserved."""
    S = np.zeros((K * K, P, P), np.float32)
    for kh in range(K):
        for kw in range(K):
            t = kh * K + kw
            for d in range(D):
                for h in range(H):
                    for w in range(W):
                        hh, ww = h + kh - 1, w + kw - 1
                        if 0 <= hh < H and 0 <= ww < W:
                            S[t, (d * H + hh) * W + ww, (d * H + h) * W + w] = 1.0
    return S


_S3_NP = _shift3d()
_S2_NP = _shift2d()


def _fused_kernel(x_ref, m3_ref, m2_ref, aux_ref, out_ref):
    """Whole forward pass on (8, 192) lane-dense flat tiles (8 identical rows).

    x_ref   : (8, 192)  f32  flattened NCDHW input, lane = c*64 + (d,h,w)
    m3_ref  : (192,192) bf16 folded conv3d operator (weights x 0/1 shift tensor)
    m2_ref  : (192,192) bf16 folded per-depth conv2d operator
    aux_ref : (8, 192)  f32  rows: b3,g3,be3,b2,g2,be2 repeated over each channel's lanes
    out_ref : (8, 192)  f32  result (row 0 reshaped to NCDHW in the wrapper)
    """
    f32 = jnp.float32
    x = x_ref[...]
    aux = aux_ref[...]

    lane = lax.broadcasted_iota(jnp.int32, (8, F), 1)
    masks = [(lane >= c * P) & (lane < (c + 1) * P) for c in range(C)]
    inv_n = 1.0 / float(P)

    def batchnorm(y, gflat, beflat):
        # Exact f32 per-channel batch statistics (biased variance, training mode),
        # computed with masked XLU lane reductions; broadcast back with VPU selects.
        mu, inv = [], []
        for c in range(C):
            s1 = jnp.sum(jnp.where(masks[c], y, 0.0), axis=1, keepdims=True) * inv_n
            s2 = jnp.sum(jnp.where(masks[c], y * y, 0.0), axis=1, keepdims=True) * inv_n
            mu.append(s1)
            inv.append(lax.rsqrt(s2 - s1 * s1 + EPS))
        meanf = jnp.where(masks[0], mu[0], jnp.where(masks[1], mu[1], mu[2]))
        invf = jnp.where(masks[0], inv[0], jnp.where(masks[1], inv[1], inv[2]))
        return (y - meanf) * invf * gflat + beflat

    # ---- Conv3d (+ bias) as ONE folded MXU matmul, then BatchNorm3d ----
    y = jnp.dot(x, m3_ref[...].astype(f32), preferred_element_type=f32) + aux[0:1, :]
    z = batchnorm(y, aux[1:2, :], aux[2:3, :])

    # ---- Conv2d per depth slice (+ bias) as ONE folded MXU matmul, then BatchNorm2d ----
    a = jnp.dot(z, m2_ref[...].astype(f32), preferred_element_type=f32) + aux[3:4, :]
    o = batchnorm(a, aux[4:5, :], aux[5:6, :])

    out_ref[...] = jnp.maximum(o, 0.0)   # ReLU


@jax.jit
def forward(x, params):
    f32 = jnp.float32
    # Flat lane layout: lane = c*64 + (d*16 + h*4 + w); 8 identical sublane rows.
    x_in = jnp.broadcast_to(x.astype(f32).reshape(1, F), (8, F))

    # Fold each conv's weights with its constant 0/1 shift tensor into ONE operator:
    #   M[(ci,q), (co,p)] = sum_t w[co,ci,t] * S[t,q,p]      (trivial XLA einsum)
    w3r = params["w3"].astype(f32).reshape(C, C, K ** 3)
    m3 = jnp.einsum("oit,tqp->iqop", w3r, jnp.asarray(_S3_NP)).reshape(F, F)
    w2r = params["w2"].astype(f32).reshape(C, C, K * K)
    m2 = jnp.einsum("oit,tqp->iqop", w2r, jnp.asarray(_S2_NP)).reshape(F, F)

    # Pack conv biases + BN affine vectors into one (8, 192) tile -> a single DMA.
    rep = lambda v: jnp.repeat(v.astype(f32), P)
    zrow = jnp.zeros((F,), f32)
    aux = jnp.stack([rep(params["b3"]), rep(params["g3"]), rep(params["be3"]),
                     rep(params["b2"]), rep(params["g2"]), rep(params["be2"]),
                     zrow, zrow])

    vspec = pl.BlockSpec(memory_space=pltpu.MemorySpace.VMEM)
    out = pl.pallas_call(
        _fused_kernel,
        out_shape=jax.ShapeDtypeStruct((8, F), f32),
        in_specs=[vspec] * 4,
        out_specs=vspec,
    )(x_in, m3.astype(jnp.bfloat16), m2.astype(jnp.bfloat16), aux)
    return out[0].reshape(1, C, D, H, W)


def reference_forward(x, p):
    """Pure-JAX reference (same semantics) used only for verification."""
    y = lax.conv_general_dilated(
        x, p["w3"], window_strides=(1, 1, 1), padding=((1, 1), (1, 1), (1, 1)),
        dimension_numbers=("NCDHW", "OIDHW", "NCDHW")) + p["b3"].reshape(1, C, 1, 1, 1)
    m = y.mean(axis=(0, 2, 3, 4), keepdims=True)
    v = ((y - m) ** 2).mean(axis=(0, 2, 3, 4), keepdims=True)
    y = (y - m) * lax.rsqrt(v + EPS) * p["g3"].reshape(1, C, 1, 1, 1) \
        + p["be3"].reshape(1, C, 1, 1, 1)
    n, c, d, h, w = y.shape
    y2 = y.transpose(0, 2, 1, 3, 4).reshape(n * d, c, h, w)  # fold depth into batch
    z = lax.conv_general_dilated(
        y2, p["w2"], window_strides=(1, 1), padding=((1, 1), (1, 1)),
        dimension_numbers=("NCHW", "OIHW", "NCHW")) + p["b2"].reshape(1, C, 1, 1)
    m = z.mean(axis=(0, 2, 3), keepdims=True)
    v = ((z - m) ** 2).mean(axis=(0, 2, 3), keepdims=True)
    z = (z - m) * lax.rsqrt(v + EPS) * p["g2"].reshape(1, C, 1, 1) \
        + p["be2"].reshape(1, C, 1, 1)
    z = jnp.maximum(z, 0.0)
    return z.reshape(n, d, c, h, w).transpose(0, 2, 1, 3, 4)


if __name__ == "__main__":
    key = jax.random.PRNGKey(0)
    kx, k1, k2, k3, k4 = jax.random.split(key, 5)
    x = jax.random.normal(kx, (1, C, D, H, W), dtype=jnp.float32)

    # Deterministic parameter init mimicking PyTorch defaults:
    #  - conv weight/bias ~ U(-1/sqrt(fan_in), 1/sqrt(fan_in))
    #  - BatchNorm affine: gamma = 1, beta = 0
    fan3 = C * K * K * K
    fan2 = C * K * K
    bnd3 = 1.0 / np.sqrt(fan3)
    bnd2 = 1.0 / np.sqrt(fan2)
    params = {
        "w3": jax.random.uniform(k1, (C, C, K, K, K), jnp.float32, -bnd3, bnd3),
        "b3": jax.random.uniform(k2, (C,), jnp.float32, -bnd3, bnd3),
        "g3": jnp.ones((C,), jnp.float32),
        "be3": jnp.zeros((C,), jnp.float32),
        "w2": jax.random.uniform(k3, (C, C, K, K), jnp.float32, -bnd2, bnd2),
        "b2": jax.random.uniform(k4, (C,), jnp.float32, -bnd2, bnd2),
        "g2": jnp.ones((C,), jnp.float32),
        "be2": jnp.zeros((C,), jnp.float32),
    }

    out = jax.block_until_ready(forward(x, params))
    ref = jax.block_until_ready(reference_forward(x, params))
    # Tolerance accounts for bf16-stored folded operators + default MXU f32 precision.
    np.testing.assert_allclose(np.asarray(out), np.asarray(ref), rtol=1e-2, atol=1e-2)
    print("KERNEL_OK")
</pallas_src>

<mosaic_0001>
module attributes {stable_mosaic.version = 11 : i64} {
  func.func @_fused_kernel(%arg0: memref<8x192xf32, #tpu.memory_space<vmem>>, %arg1: memref<192x192xbf16, #tpu.memory_space<vmem>>, %arg2: memref<192x192xbf16, #tpu.memory_space<vmem>>, %arg3: memref<8x192xf32, #tpu.memory_space<vmem>>, %arg4: memref<8x192xf32, #tpu.memory_space<vmem>>) attributes {dimension_semantics = [], scalar_prefetch = 0 : i64, scratch_operands = 0 : i64, tpu.core_type = #tpu.core_type<tc>} {
    %c0 = arith.constant 0 : index
    %c0_0 = arith.constant 0 : index
    %0 = vector.load %arg0[%c0, %c0_0] : memref<8x192xf32, #tpu.memory_space<vmem>>, vector<8x192xf32>
    %c0_1 = arith.constant 0 : index
    %c0_2 = arith.constant 0 : index
    %1 = vector.load %arg3[%c0_1, %c0_2] : memref<8x192xf32, #tpu.memory_space<vmem>>, vector<8x192xf32>
    %2 = tpu.iota {dimensions = array<i32: 1>} : vector<8x192xi32>
    %c0_i32 = arith.constant 0 : i32
    %3 = vector.broadcast %c0_i32 : i32 to vector<8x192xi32>
    %4 = arith.cmpi sge, %2, %3 : vector<8x192xi32>
    %c64_i32 = arith.constant 64 : i32
    %5 = vector.broadcast %c64_i32 : i32 to vector<8x192xi32>
    %6 = arith.cmpi slt, %2, %5 : vector<8x192xi32>
    %7 = arith.andi %4, %6 : vector<8x192xi1>
    %c64_i32_3 = arith.constant 64 : i32
    %8 = vector.broadcast %c64_i32_3 : i32 to vector<8x192xi32>
    %9 = arith.cmpi sge, %2, %8 : vector<8x192xi32>
    %c128_i32 = arith.constant 128 : i32
    %10 = vector.broadcast %c128_i32 : i32 to vector<8x192xi32>
    %11 = arith.cmpi slt, %2, %10 : vector<8x192xi32>
    %12 = arith.andi %9, %11 : vector<8x192xi1>
    %c128_i32_4 = arith.constant 128 : i32
    %13 = vector.broadcast %c128_i32_4 : i32 to vector<8x192xi32>
    %14 = arith.cmpi sge, %2, %13 : vector<8x192xi32>
    %c192_i32 = arith.constant 192 : i32
    %15 = vector.broadcast %c192_i32 : i32 to vector<8x192xi32>
    %16 = arith.cmpi slt, %2, %15 : vector<8x192xi32>
    %17 = arith.andi %14, %16 : vector<8x192xi1>
    %c0_5 = arith.constant 0 : index
    %c0_6 = arith.constant 0 : index
    %18 = vector.load %arg1[%c0_5, %c0_6] : memref<192x192xbf16, #tpu.memory_space<vmem>>, vector<192x192xbf16>
    %19 = arith.extf %18 : vector<192x192xbf16> to vector<192x192xf32>
    %cst = arith.constant dense<0.000000e+00> : vector<8x192xf32>
    %20 = tpu.matmul %0, %19, %cst {dimension_numbers = #tpu.dot_dimension_numbers<[1], [0], [0], [1], [0, 0, 1, 1], [], []>} : vector<8x192xf32>, vector<192x192xf32>, vector<8x192xf32> -> vector<8x192xf32>
    %21 = vector.extract_strided_slice %1 {offsets = [0, 0], sizes = [1, 192], strides = [1, 1]} : vector<8x192xf32> to vector<1x192xf32>
    %22 = vector.broadcast %21 : vector<1x192xf32> to vector<8x192xf32>
    %23 = arith.addf %20, %22 : vector<8x192xf32>
    %24 = vector.extract_strided_slice %1 {offsets = [1, 0], sizes = [1, 192], strides = [1, 1]} : vector<8x192xf32> to vector<1x192xf32>
    %25 = vector.extract_strided_slice %1 {offsets = [2, 0], sizes = [1, 192], strides = [1, 1]} : vector<8x192xf32> to vector<1x192xf32>
    %cst_7 = arith.constant 0.000000e+00 : f32
    %26 = vector.broadcast %cst_7 : f32 to vector<8x192xf32>
    %27 = arith.select %7, %23, %26 : vector<8x192xi1>, vector<8x192xf32>
    %cst_8 = arith.constant dense<0.000000e+00> : vector<8xf32>
    %28 = vector.multi_reduction <add>, %27, %cst_8 [1] : vector<8x192xf32> to vector<8xf32>
    %29 = vector.shape_cast %28 : vector<8xf32> to vector<8x1xf32>
    %cst_9 = arith.constant 1.562500e-02 : f32
    %30 = vector.broadcast %cst_9 : f32 to vector<8x1xf32>
    %31 = arith.mulf %29, %30 : vector<8x1xf32>
    %32 = arith.mulf %23, %23 : vector<8x192xf32>
    %cst_10 = arith.constant 0.000000e+00 : f32
    %33 = vector.broadcast %cst_10 : f32 to vector<8x192xf32>
    %34 = arith.select %7, %32, %33 : vector<8x192xi1>, vector<8x192xf32>
    %cst_11 = arith.constant dense<0.000000e+00> : vector<8xf32>
    %35 = vector.multi_reduction <add>, %34, %cst_11 [1] : vector<8x192xf32> to vector<8xf32>
    %36 = vector.shape_cast %35 : vector<8xf32> to vector<8x1xf32>
    %cst_12 = arith.constant 1.562500e-02 : f32
    %37 = vector.broadcast %cst_12 : f32 to vector<8x1xf32>
    %38 = arith.mulf %36, %37 : vector<8x1xf32>
    %39 = arith.mulf %31, %31 : vector<8x1xf32>
    %40 = arith.subf %38, %39 : vector<8x1xf32>
    %cst_13 = arith.constant 9.99999974E-6 : f32
    %41 = vector.broadcast %cst_13 : f32 to vector<8x1xf32>
    %42 = arith.addf %40, %41 : vector<8x1xf32>
    %43 = math.rsqrt %42 : vector<8x1xf32>
    %cst_14 = arith.constant 0.000000e+00 : f32
    %44 = vector.broadcast %cst_14 : f32 to vector<8x192xf32>
    %45 = arith.select %12, %23, %44 : vector<8x192xi1>, vector<8x192xf32>
    %cst_15 = arith.constant dense<0.000000e+00> : vector<8xf32>
    %46 = vector.multi_reduction <add>, %45, %cst_15 [1] : vector<8x192xf32> to vector<8xf32>
    %47 = vector.shape_cast %46 : vector<8xf32> to vector<8x1xf32>
    %cst_16 = arith.constant 1.562500e-02 : f32
    %48 = vector.broadcast %cst_16 : f32 to vector<8x1xf32>
    %49 = arith.mulf %47, %48 : vector<8x1xf32>
    %50 = arith.mulf %23, %23 : vector<8x192xf32>
    %cst_17 = arith.constant 0.000000e+00 : f32
    %51 = vector.broadcast %cst_17 : f32 to vector<8x192xf32>
    %52 = arith.select %12, %50, %51 : vector<8x192xi1>, vector<8x192xf32>
    %cst_18 = arith.constant dense<0.000000e+00> : vector<8xf32>
    %53 = vector.multi_reduction <add>, %52, %cst_18 [1] : vector<8x192xf32> to vector<8xf32>
    %54 = vector.shape_cast %53 : vector<8xf32> to vector<8x1xf32>
    %cst_19 = arith.constant 1.562500e-02 : f32
    %55 = vector.broadcast %cst_19 : f32 to vector<8x1xf32>
    %56 = arith.mulf %54, %55 : vector<8x1xf32>
    %57 = arith.mulf %49, %49 : vector<8x1xf32>
    %58 = arith.subf %56, %57 : vector<8x1xf32>
    %cst_20 = arith.constant 9.99999974E-6 : f32
    %59 = vector.broadcast %cst_20 : f32 to vector<8x1xf32>
    %60 = arith.addf %58, %59 : vector<8x1xf32>
    %61 = math.rsqrt %60 : vector<8x1xf32>
    %cst_21 = arith.constant 0.000000e+00 : f32
    %62 = vector.broadcast %cst_21 : f32 to vector<8x192xf32>
    %63 = arith.select %17, %23, %62 : vector<8x192xi1>, vector<8x192xf32>
    %cst_22 = arith.constant dense<0.000000e+00> : vector<8xf32>
    %64 = vector.multi_reduction <add>, %63, %cst_22 [1] : vector<8x192xf32> to vector<8xf32>
    %65 = vector.shape_cast %64 : vector<8xf32> to vector<8x1xf32>
    %cst_23 = arith.constant 1.562500e-02 : f32
    %66 = vector.broadcast %cst_23 : f32 to vector<8x1xf32>
    %67 = arith.mulf %65, %66 : vector<8x1xf32>
    %68 = arith.mulf %23, %23 : vector<8x192xf32>
    %cst_24 = arith.constant 0.000000e+00 : f32
    %69 = vector.broadcast %cst_24 : f32 to vector<8x192xf32>
    %70 = arith.select %17, %68, %69 : vector<8x192xi1>, vector<8x192xf32>
    %cst_25 = arith.constant dense<0.000000e+00> : vector<8xf32>
    %71 = vector.multi_reduction <add>, %70, %cst_25 [1] : vector<8x192xf32> to vector<8xf32>
    %72 = vector.shape_cast %71 : vector<8xf32> to vector<8x1xf32>
    %cst_26 = arith.constant 1.562500e-02 : f32
    %73 = vector.broadcast %cst_26 : f32 to vector<8x1xf32>
    %74 = arith.mulf %72, %73 : vector<8x1xf32>
    %75 = arith.mulf %67, %67 : vector<8x1xf32>
    %76 = arith.subf %74, %75 : vector<8x1xf32>
    %cst_27 = arith.constant 9.99999974E-6 : f32
    %77 = vector.broadcast %cst_27 : f32 to vector<8x1xf32>
    %78 = arith.addf %76, %77 : vector<8x1xf32>
    %79 = math.rsqrt %78 : vector<8x1xf32>
    %80 = vector.shape_cast %49 : vector<8x1xf32> to vector<8x1xf32>
    %81 = vector.broadcast %80 : vector<8x1xf32> to vector<8x192xf32>
    %82 = vector.shape_cast %67 : vector<8x1xf32> to vector<8x1xf32>
    %83 = vector.broadcast %82 : vector<8x1xf32> to vector<8x192xf32>
    %84 = arith.select %12, %81, %83 : vector<8x192xi1>, vector<8x192xf32>
    %85 = vector.shape_cast %31 : vector<8x1xf32> to vector<8x1xf32>
    %86 = vector.broadcast %85 : vector<8x1xf32> to vector<8x192xf32>
    %87 = arith.select %7, %86, %84 : vector<8x192xi1>, vector<8x192xf32>
    %88 = vector.shape_cast %61 : vector<8x1xf32> to vector<8x1xf32>
    %89 = vector.broadcast %88 : vector<8x1xf32> to vector<8x192xf32>
    %90 = vector.shape_cast %79 : vector<8x1xf32> to vector<8x1xf32>
    %91 = vector.broadcast %90 : vector<8x1xf32> to vector<8x192xf32>
    %92 = arith.select %12, %89, %91 : vector<8x192xi1>, vector<8x192xf32>
    %93 = vector.shape_cast %43 : vector<8x1xf32> to vector<8x1xf32>
    %94 = vector.broadcast %93 : vector<8x1xf32> to vector<8x192xf32>
    %95 = arith.select %7, %94, %92 : vector<8x192xi1>, vector<8x192xf32>
    %96 = arith.subf %23, %87 : vector<8x192xf32>
    %97 = arith.mulf %96, %95 : vector<8x192xf32>
    %98 = vector.broadcast %24 : vector<1x192xf32> to vector<8x192xf32>
    %99 = arith.mulf %97, %98 : vector<8x192xf32>
    %100 = vector.broadcast %25 : vector<1x192xf32> to vector<8x192xf32>
    %101 = arith.addf %99, %100 : vector<8x192xf32>
    %c0_28 = arith.constant 0 : index
    %c0_29 = arith.constant 0 : index
    %102 = vector.load %arg2[%c0_28, %c0_29] : memref<192x192xbf16, #tpu.memory_space<vmem>>, vector<192x192xbf16>
    %103 = arith.extf %102 : vector<192x192xbf16> to vector<192x192xf32>
    %cst_30 = arith.constant dense<0.000000e+00> : vector<8x192xf32>
    %104 = tpu.matmul %101, %103, %cst_30 {dimension_numbers = #tpu.dot_dimension_numbers<[1], [0], [0], [1], [0, 0, 1, 1], [], []>} : vector<8x192xf32>, vector<192x192xf32>, vector<8x192xf32> -> vector<8x192xf32>
    %105 = vector.extract_strided_slice %1 {offsets = [3, 0], sizes = [1, 192], strides = [1, 1]} : vector<8x192xf32> to vector<1x192xf32>
    %106 = vector.broadcast %105 : vector<1x192xf32> to vector<8x192xf32>
    %107 = arith.addf %104, %106 : vector<8x192xf32>
    %108 = vector.extract_strided_slice %1 {offsets = [4, 0], sizes = [1, 192], strides = [1, 1]} : vector<8x192xf32> to vector<1x192xf32>
    %109 = vector.extract_strided_slice %1 {offsets = [5, 0], sizes = [1, 192], strides = [1, 1]} : vector<8x192xf32> to vector<1x192xf32>
    %cst_31 = arith.constant 0.000000e+00 : f32
    %110 = vector.broadcast %cst_31 : f32 to vector<8x192xf32>
    %111 = arith.select %7, %107, %110 : vector<8x192xi1>, vector<8x192xf32>
    %cst_32 = arith.constant dense<0.000000e+00> : vector<8xf32>
    %112 = vector.multi_reduction <add>, %111, %cst_32 [1] : vector<8x192xf32> to vector<8xf32>
    %113 = vector.shape_cast %112 : vector<8xf32> to vector<8x1xf32>
    %cst_33 = arith.constant 1.562500e-02 : f32
    %114 = vector.broadcast %cst_33 : f32 to vector<8x1xf32>
    %115 = arith.mulf %113, %114 : vector<8x1xf32>
    %116 = arith.mulf %107, %107 : vector<8x192xf32>
    %cst_34 = arith.constant 0.000000e+00 : f32
    %117 = vector.broadcast %cst_34 : f32 to vector<8x192xf32>
    %118 = arith.select %7, %116, %117 : vector<8x192xi1>, vector<8x192xf32>
    %cst_35 = arith.constant dense<0.000000e+00> : vector<8xf32>
    %119 = vector.multi_reduction <add>, %118, %cst_35 [1] : vector<8x192xf32> to vector<8xf32>
    %120 = vector.shape_cast %119 : vector<8xf32> to vector<8x1xf32>
    %cst_36 = arith.constant 1.562500e-02 : f32
    %121 = vector.broadcast %cst_36 : f32 to vector<8x1xf32>
    %122 = arith.mulf %120, %121 : vector<8x1xf32>
    %123 = arith.mulf %115, %115 : vector<8x1xf32>
    %124 = arith.subf %122, %123 : vector<8x1xf32>
    %cst_37 = arith.constant 9.99999974E-6 : f32
    %125 = vector.broadcast %cst_37 : f32 to vector<8x1xf32>
    %126 = arith.addf %124, %125 : vector<8x1xf32>
    %127 = math.rsqrt %126 : vector<8x1xf32>
    %cst_38 = arith.constant 0.000000e+00 : f32
    %128 = vector.broadcast %cst_38 : f32 to vector<8x192xf32>
    %129 = arith.select %12, %107, %128 : vector<8x192xi1>, vector<8x192xf32>
    %cst_39 = arith.constant dense<0.000000e+00> : vector<8xf32>
    %130 = vector.multi_reduction <add>, %129, %cst_39 [1] : vector<8x192xf32> to vector<8xf32>
    %131 = vector.shape_cast %130 : vector<8xf32> to vector<8x1xf32>
    %cst_40 = arith.constant 1.562500e-02 : f32
    %132 = vector.broadcast %cst_40 : f32 to vector<8x1xf32>
    %133 = arith.mulf %131, %132 : vector<8x1xf32>
    %134 = arith.mulf %107, %107 : vector<8x192xf32>
    %cst_41 = arith.constant 0.000000e+00 : f32
    %135 = vector.broadcast %cst_41 : f32 to vector<8x192xf32>
    %136 = arith.select %12, %134, %135 : vector<8x192xi1>, vector<8x192xf32>
    %cst_42 = arith.constant dense<0.000000e+00> : vector<8xf32>
    %137 = vector.multi_reduction <add>, %136, %cst_42 [1] : vector<8x192xf32> to vector<8xf32>
    %138 = vector.shape_cast %137 : vector<8xf32> to vector<8x1xf32>
    %cst_43 = arith.constant 1.562500e-02 : f32
    %139 = vector.broadcast %cst_43 : f32 to vector<8x1xf32>
    %140 = arith.mulf %138, %139 : vector<8x1xf32>
    %141 = arith.mulf %133, %133 : vector<8x1xf32>
    %142 = arith.subf %140, %141 : vector<8x1xf32>
    %cst_44 = arith.constant 9.99999974E-6 : f32
    %143 = vector.broadcast %cst_44 : f32 to vector<8x1xf32>
    %144 = arith.addf %142, %143 : vector<8x1xf32>
    %145 = math.rsqrt %144 : vector<8x1xf32>
    %cst_45 = arith.constant 0.000000e+00 : f32
    %146 = vector.broadcast %cst_45 : f32 to vector<8x192xf32>
    %147 = arith.select %17, %107, %146 : vector<8x192xi1>, vector<8x192xf32>
    %cst_46 = arith.constant dense<0.000000e+00> : vector<8xf32>
    %148 = vector.multi_reduction <add>, %147, %cst_46 [1] : vector<8x192xf32> to vector<8xf32>
    %149 = vector.shape_cast %148 : vector<8xf32> to vector<8x1xf32>
    %cst_47 = arith.constant 1.562500e-02 : f32
    %150 = vector.broadcast %cst_47 : f32 to vector<8x1xf32>
    %151 = arith.mulf %149, %150 : vector<8x1xf32>
    %152 = arith.mulf %107, %107 : vector<8x192xf32>
    %cst_48 = arith.constant 0.000000e+00 : f32
    %153 = vector.broadcast %cst_48 : f32 to vector<8x192xf32>
    %154 = arith.select %17, %152, %153 : vector<8x192xi1>, vector<8x192xf32>
    %cst_49 = arith.constant dense<0.000000e+00> : vector<8xf32>
    %155 = vector.multi_reduction <add>, %154, %cst_49 [1] : vector<8x192xf32> to vector<8xf32>
    %156 = vector.shape_cast %155 : vector<8xf32> to vector<8x1xf32>
    %cst_50 = arith.constant 1.562500e-02 : f32
    %157 = vector.broadcast %cst_50 : f32 to vector<8x1xf32>
    %158 = arith.mulf %156, %157 : vector<8x1xf32>
    %159 = arith.mulf %151, %151 : vector<8x1xf32>
    %160 = arith.subf %158, %159 : vector<8x1xf32>
    %cst_51 = arith.constant 9.99999974E-6 : f32
    %161 = vector.broadcast %cst_51 : f32 to vector<8x1xf32>
    %162 = arith.addf %160, %161 : vector<8x1xf32>
    %163 = math.rsqrt %162 : vector<8x1xf32>
    %164 = vector.shape_cast %133 : vector<8x1xf32> to vector<8x1xf32>
    %165 = vector.broadcast %164 : vector<8x1xf32> to vector<8x192xf32>
    %166 = vector.shape_cast %151 : vector<8x1xf32> to vector<8x1xf32>
    %167 = vector.broadcast %166 : vector<8x1xf32> to vector<8x192xf32>
    %168 = arith.select %12, %165, %167 : vector<8x192xi1>, vector<8x192xf32>
    %169 = vector.shape_cast %115 : vector<8x1xf32> to vector<8x1xf32>
    %170 = vector.broadcast %169 : vector<8x1xf32> to vector<8x192xf32>
    %171 = arith.select %7, %170, %168 : vector<8x192xi1>, vector<8x192xf32>
    %172 = vector.shape_cast %145 : vector<8x1xf32> to vector<8x1xf32>
    %173 = vector.broadcast %172 : vector<8x1xf32> to vector<8x192xf32>
    %174 = vector.shape_cast %163 : vector<8x1xf32> to vector<8x1xf32>
    %175 = vector.broadcast %174 : vector<8x1xf32> to vector<8x192xf32>
    %176 = arith.select %12, %173, %175 : vector<8x192xi1>, vector<8x192xf32>
    %177 = vector.shape_cast %127 : vector<8x1xf32> to vector<8x1xf32>
    %178 = vector.broadcast %177 : vector<8x1xf32> to vector<8x192xf32>
    %179 = arith.select %7, %178, %176 : vector<8x192xi1>, vector<8x192xf32>
    %180 = arith.subf %107, %171 : vector<8x192xf32>
    %181 = arith.mulf %180, %179 : vector<8x192xf32>
    %182 = vector.broadcast %108 : vector<1x192xf32> to vector<8x192xf32>
    %183 = arith.mulf %181, %182 : vector<8x192xf32>
    %184 = vector.broadcast %109 : vector<1x192xf32> to vector<8x192xf32>
    %185 = arith.addf %183, %184 : vector<8x192xf32>
    %cst_52 = arith.constant 0.000000e+00 : f32
    %186 = vector.broadcast %cst_52 : f32 to vector<8x192xf32>
    %187 = arith.maximumf %185, %186 : vector<8x192xf32>
    %c0_53 = arith.constant 0 : index
    %c0_54 = arith.constant 0 : index
    %188 = vector.load %arg4[%c0_53, %c0_54] : memref<8x192xf32, #tpu.memory_space<vmem>>, vector<8x192xf32>
    tpu.vector_store %arg4[%c0_53, %c0_54], %187 {strides = array<i32>} : memref<8x192xf32, #tpu.memory_space<vmem>>, vector<8x192xf32>,
    return
  }
}

</mosaic_0001>

<bundles_post_ra>
// kernel: squeeze.1
= control target key start
LH: loop header
LB: loop body
LE: loop exit
PB: predicated region body
PF: predicated region fallthrough
CT: control target
= control target key end

     0   :  { %s483_s0 = inlined_call_operand.vmem [shape: f32[192], index: 0, kind: input, shape index: {}]   ;;  %s484_s1 = inlined_call_operand.hbm [shape: f32[1,3,4,4,4], index: 1, kind: output, shape index: {}]  }
   0x1   :  { %v6_v0 = vld [vmem:[%s483_s0] sm:$0x3] }
   0x2   :  { %7 = vst [vmem:[#allocation3] sm:$0x3] %v6_v0 }
   0x3   :  { %2 = vsyncpa [#allocation1], 0  ;;  %s387_s0 = smov 124   ;;  %s388_s8 = smov 116   ;;  %vm9_vm0 = vcmask 31744  }
   0x4   :  { %s389_s9 = smov 120   ;;  %s390_s10 = smov 112  }
   0x5   :  { %s391_s11 = smov 108   ;;  %s392_s12 = smov 104  }
   0x6   :  { %s393_s13 = smov 100   ;;  %s394_s14 = smov 96  }
   0x7   :  { %s395_s15 = smov 92   ;;  %s396_s16 = smov 88  }
   0x8   :  { %s397_s17 = smov 84   ;;  %s398_s18 = smov 80  }
   0x9   :  { %v13_v1 = vld [vmem:[#allocation3] sm:$0x3]   ;;  %s399_s19 = smov 76   ;;  %s400_s20 = smov 72  }
   0xa   :  { %v29_v2 = vld [vmem:[#allocation3] sm:$0x3]   ;;  %14 = vrot.lane.b32.xlu0 %v13_v1, %s387_s0  ;;  %s401_s21 = smov 68   ;;  %s402_s22 = smov 64  }
   0xb   :  { %30 = vrot.lane.b32.xlu1 %v29_v2, %s388_s8  ;;  %v21_v3 = vld [vmem:[#allocation3] sm:$0x3]   ;;  %s403_s23 = smov 60   ;;  %s404_s24 = smov 56  }
   0xc   :  { %v37_v4 = vld [vmem:[#allocation3] sm:$0x3]   ;;  %s405_s25 = smov 52   ;;  %s406_s26 = smov 48  }
   0xd   :  { %v45_v5 = vld [vmem:[#allocation3] sm:$0x3]   ;;  %s407_s27 = smov 44   ;;  %s408_s28 = smov 40  }
   0xe   :  { %22 = vrot.lane.b32.xlu0 %v21_v3, %s389_s9  ;;  %v53_v6 = vld [vmem:[#allocation3] sm:$0x3]   ;;  %s409_s29 = smov 36   ;;  %s410_s30 = smov 32  }
   0xf   :  { %38 = vrot.lane.b32.xlu1 %v37_v4, %s390_s10  ;;  %v61_v7 = vld [vmem:[#allocation3] sm:$0x3]   ;;  %s411_s2 = smov 28   ;;  %s412_s3 = smov 24  }
  0x10   :  { %v69_v8 = vld [vmem:[#allocation3] sm:$0x3]   ;;  %s413_s4 = smov 20   ;;  %s414_s5 = smov 16  }
  0x11   :  { %v8_v9 = vld [vmem:[#allocation3] sm:$0x3]   ;;  %s415_s6 = smov 12   ;;  %s416_s7 = smov 8  }
  0x12   :  { %46 = vrot.lane.b32.xlu0 %v45_v5, %s391_s11  ;;  %v77_v10 = vld [vmem:[#allocation3] sm:$0x3]   ;;  %12 = vst.msk [vmem:[#allocation2 + $0x3f] sm:$0x2] %vm9_vm0, %v8_v9   ;;  %10 = vst.msk [vmem:[#allocation2] sm:$0x1] %vm9_vm0, %v8_v9  }
  0x13   :  { %54 = vrot.lane.b32.xlu1 %v53_v6, %s392_s12  ;;  %v85_v11 = vld [vmem:[#allocation3] sm:$0x3]   ;;  %s417_s0 = smov 4   ;;  %s418_s8 = smov [#allocation0]  }
  0x14   :  { %v93_v12 = vld [vmem:[#allocation3] sm:$0x3]   ;;  %s317_s9 = sshll.u32 %s418_s8, 4  ;;  %s318_s9 = int_to_ptr.vmem [resolvable:$true] %s317_s9 }
  0x15   :  { %v101_v13 = vld [vmem:[#allocation3] sm:$0x3]   ;;  %s365_s10 = scalar_lea.vmem %s318_s9, 768  ;;  %p370_p1 = scmp.lt.s32.totalorder %s318_s9, %s318_s9 }
  0x16   :  { %62 = vrot.lane.b32.xlu0 %v61_v7, %s393_s13  ;;  %v109_v14 = vld [vmem:[#allocation3] sm:$0x3]   ;;  %p366_p0 = scmp.ne.s32.totalorder %s318_s9, %s365_s10  ;;  %p371_p2 = scmp.lt.s32.totalorder %s365_s10, %s365_s10 }
  0x17   :  { %70 = vrot.lane.b32.xlu1 %v69_v8, %s394_s14  ;;  %v117_v15 = vld [vmem:[#allocation3] sm:$0x3]  }
  0x18   :  { %v125_v16 = vld [vmem:[#allocation3] sm:$0x3]   ;;  %p372_p3 = por %p371_p2, %p370_p1 }
  0x19   :  { %v133_v17 = vld [vmem:[#allocation3] sm:$0x1]  }
  0x1a   :  { %78 = vrot.lane.b32.xlu0 %v77_v10, %s395_s15  ;;  %v139_v18 = vld [vmem:[#allocation3] sm:$0x1]   ;;  %p373_p4 = pnand %p372_p3, %p366_p0 }
  0x1b   :  { %86 = vrot.lane.b32.xlu1 %v85_v11, %s396_s16  ;;  %v145_v19 = vld [vmem:[#allocation3] sm:$0x1]  }
  0x1c   :  { %v151_v20 = vld [vmem:[#allocation3] sm:$0x1]  }
  0x1d   :  { %v157_v21 = vld [vmem:[#allocation3] sm:$0x1]  }
  0x1e   :  { %94 = vrot.lane.b32.xlu0 %v93_v12, %s397_s17  ;;  %v163_v22 = vld [vmem:[#allocation3] sm:$0x1]  }
  0x1f   :  { %102 = vrot.lane.b32.xlu1 %v101_v13, %s398_s18  ;;  %v169_v23 = vld [vmem:[#allocation3] sm:$0x1]  }
  0x20   :  { %v175_v24 = vld [vmem:[#allocation3] sm:$0x1]  }
  0x21   :  { %v181_v25 = vld [vmem:[#allocation3] sm:$0x1]  }
  0x22   :  { %110 = vrot.lane.b32.xlu0 %v109_v14, %s399_s19  ;;  %v187_v26 = vld [vmem:[#allocation3] sm:$0x1]  }
  0x23   :  { %118 = vrot.lane.b32.xlu1 %v117_v15, %s400_s20  ;;  %v193_v27 = vld [vmem:[#allocation3] sm:$0x1]  }
  0x24   :  { %v199_v28 = vld [vmem:[#allocation3] sm:$0x1]  }
  0x25   :  { %v205_v29 = vld [vmem:[#allocation3] sm:$0x1]  }
  0x26   :  { %126 = vrot.lane.b32.xlu0 %v125_v16, %s401_s21  ;;  %v211_v30 = vld [vmem:[#allocation3] sm:$0x1]  }
  0x27   :  { %134 = vrot.lane.b32.xlu1 %v133_v17, %s402_s22  ;;  %v217_v31 = vld [vmem:[#allocation3] sm:$0x1]  }
  0x28   :  { %v223_v32 = vld [vmem:[#allocation3] sm:$0x1]  }
  0x2a   :  { %140 = vrot.lane.b32.xlu0 %v139_v18, %s403_s23 }
  0x2b   :  { %146 = vrot.lane.b32.xlu1 %v145_v19, %s404_s24 }
  0x2e   :  { %152 = vrot.lane.b32.xlu0 %v151_v20, %s405_s25 }
  0x2f   :  { %158 = vrot.lane.b32.xlu1 %v157_v21, %s406_s26 }
  0x32   :  { %164 = vrot.lane.b32.xlu0 %v163_v22, %s407_s27 }
  0x33   :  { %170 = vrot.lane.b32.xlu1 %v169_v23, %s408_s28 }
  0x36   :  { %176 = vrot.lane.b32.xlu0 %v175_v24, %s409_s29 }
  0x37   :  { %182 = vrot.lane.b32.xlu1 %v181_v25, %s410_s30 }
  0x3a   :  { %188 = vrot.lane.b32.xlu0 %v187_v26, %s411_s2 }
  0x3b   :  { %194 = vrot.lane.b32.xlu1 %v193_v27, %s412_s3 }
  0x3e   :  { %200 = vrot.lane.b32.xlu0 %v199_v28, %s413_s4 }
  0x3f   :  { %206 = vrot.lane.b32.xlu1 %v205_v29, %s414_s5 }
  0x42   :  { %212 = vrot.lane.b32.xlu0 %v211_v30, %s415_s6 }
  0x43   :  { %218 = vrot.lane.b32.xlu1 %v217_v31, %s416_s7 }
  0x46   :  { %224 = vrot.lane.b32.xlu0 %v223_v32, %s417_s0 }
  0x7c   :  { %v15_v33 = vpop.permute.xlu0 %14  }
  0x7d   :  { %v31_v34 = vpop.permute.xlu1 %30   ;;  %18 = vst.msk [vmem:[#allocation2 + $0x1] sm:$0x1] %vm9_vm0, %v15_v33   ;;  %20 = vst.msk [vmem:[#allocation2 + $0x40] sm:$0x2] %vm9_vm0, %v15_v33  }
  0x7e   :  { %34 = vst.msk [vmem:[#allocation2 + $0x3] sm:$0x1] %vm9_vm0, %v31_v34   ;;  %36 = vst.msk [vmem:[#allocation2 + $0x42] sm:$0x2] %vm9_vm0, %v31_v34  }
  0x80   :  { %v23_v35 = vpop.permute.xlu0 %22  }
  0x81   :  { %v39_v36 = vpop.permute.xlu1 %38   ;;  %26 = vst.msk [vmem:[#allocation2 + $0x2] sm:$0x1] %vm9_vm0, %v23_v35   ;;  %28 = vst.msk [vmem:[#allocation2 + $0x41] sm:$0x2] %vm9_vm0, %v23_v35  }
  0x82   :  { %42 = vst.msk [vmem:[#allocation2 + $0x8] sm:$0x1] %vm9_vm0, %v39_v36   ;;  %44 = vst.msk [vmem:[#allocation2 + $0x47] sm:$0x2] %vm9_vm0, %v39_v36  }
  0x84   :  { %v47_v37 = vpop.permute.xlu0 %46  }
  0x85   :  { %v55_v38 = vpop.permute.xlu1 %54   ;;  %50 = vst.msk [vmem:[#allocation2 + $0x9] sm:$0x1] %vm9_vm0, %v47_v37   ;;  %52 = vst.msk [vmem:[#allocation2 + $0x48] sm:$0x2] %vm9_vm0, %v47_v37  }
  0x86   :  { %58 = vst.msk [vmem:[#allocation2 + $0xa] sm:$0x1] %vm9_vm0, %v55_v38   ;;  %60 = vst.msk [vmem:[#allocation2 + $0x49] sm:$0x2] %vm9_vm0, %v55_v38  }
  0x88   :  { %v233_v39 = vld [vmem:[#allocation2] sm:$0xf]  ;;  %v63_v41 = vpop.permute.xlu0 %62  }
  0x89   :  { %v286_v40 = vld [vmem:[#allocation2 + $0x40] sm:$0xf]  ;;  %v71_v42 = vpop.permute.xlu1 %70   ;;  %236 = vst [vmem:[#allocation0] sm:$0xf] %v233_v39  ;;  %66 = vst.msk [vmem:[#allocation2 + $0xb] sm:$0x1] %vm9_vm0, %v63_v41  }
  0x8a   :  { %291 = vst [vmem:[#allocation0 + $0x20] sm:$0xf] %v286_v40  ;;  %68 = vst.msk [vmem:[#allocation2 + $0x4a] sm:$0x2] %vm9_vm0, %v63_v41  }
  0x8b   :  { %74 = vst.msk [vmem:[#allocation2 + $0x10] sm:$0x1] %vm9_vm0, %v71_v42   ;;  %76 = vst.msk [vmem:[#allocation2 + $0x4f] sm:$0x2] %vm9_vm0, %v71_v42  }
  0x8c   :  { %v79_v43 = vpop.permute.xlu0 %78  }
  0x8d   :  { %v87_v44 = vpop.permute.xlu1 %86   ;;  %82 = vst.msk [vmem:[#allocation2 + $0x11] sm:$0x1] %vm9_vm0, %v79_v43   ;;  %84 = vst.msk [vmem:[#allocation2 + $0x50] sm:$0x2] %vm9_vm0, %v79_v43  }
  0x8e   :  { %90 = vst.msk [vmem:[#allocation2 + $0x12] sm:$0x1] %vm9_vm0, %v87_v44   ;;  %92 = vst.msk [vmem:[#allocation2 + $0x51] sm:$0x2] %vm9_vm0, %v87_v44  }
  0x90   :  { %v238_v45 = vld [vmem:[#allocation2 + $0x8] sm:$0xf]  ;;  %v95_v47 = vpop.permute.xlu0 %94  }
  0x91   :  { %v293_v46 = vld [vmem:[#allocation2 + $0x48] sm:$0xf]  ;;  %v103_v48 = vpop.permute.xlu1 %102   ;;  %242 = vst [vmem:[#allocation0 + $0x4] sm:$0xf] %v238_v45  ;;  %98 = vst.msk [vmem:[#allocation2 + $0x13] sm:$0x1] %vm9_vm0, %v95_v47  }
  0x92   :  { %298 = vst [vmem:[#allocation0 + $0x24] sm:$0xf] %v293_v46  ;;  %100 = vst.msk [vmem:[#allocation2 + $0x52] sm:$0x2] %vm9_vm0, %v95_v47  }
  0x93   :  { %106 = vst.msk [vmem:[#allocation2 + $0x18] sm:$0x1] %vm9_vm0, %v103_v48   ;;  %108 = vst.msk [vmem:[#allocation2 + $0x57] sm:$0x2] %vm9_vm0, %v103_v48  }
  0x94   :  { %v111_v49 = vpop.permute.xlu0 %110  }
  0x95   :  { %v119_v50 = vpop.permute.xlu1 %118   ;;  %114 = vst.msk [vmem:[#allocation2 + $0x19] sm:$0x1] %vm9_vm0, %v111_v49   ;;  %116 = vst.msk [vmem:[#allocation2 + $0x58] sm:$0x2] %vm9_vm0, %v111_v49  }
  0x96   :  { %122 = vst.msk [vmem:[#allocation2 + $0x1a] sm:$0x1] %vm9_vm0, %v119_v50   ;;  %124 = vst.msk [vmem:[#allocation2 + $0x59] sm:$0x2] %vm9_vm0, %v119_v50  }
  0x98   :  { %v244_v52 = vld [vmem:[#allocation2 + $0x10] sm:$0xf]  ;;  %v127_v53 = vpop.permute.xlu0 %126  }
  0x99   :  { %v300_v51 = vld [vmem:[#allocation2 + $0x50] sm:$0xf]  ;;  %v135_v54 = vpop.permute.xlu1 %134   ;;  %249 = vst [vmem:[#allocation0 + $0x8] sm:$0xf] %v244_v52  ;;  %130 = vst.msk [vmem:[#allocation2 + $0x1b] sm:$0x1] %vm9_vm0, %v127_v53  }
  0x9a   :  { %305 = vst [vmem:[#allocation0 + $0x28] sm:$0xf] %v300_v51  ;;  %132 = vst.msk [vmem:[#allocation2 + $0x5a] sm:$0x2] %vm9_vm0, %v127_v53  }
  0x9b   :  { %138 = vst.msk [vmem:[#allocation2 + $0x20] sm:$0x1] %vm9_vm0, %v135_v54  }
  0x9c   :  { %v141_v55 = vpop.permute.xlu0 %140  }
  0x9d   :  { %v147_v56 = vpop.permute.xlu1 %146   ;;  %144 = vst.msk [vmem:[#allocation2 + $0x21] sm:$0x1] %vm9_vm0, %v141_v55  }
  0x9e   :  { %150 = vst.msk [vmem:[#allocation2 + $0x22] sm:$0x1] %vm9_vm0, %v147_v56  }
  0xa0   :  { %v251_v57 = vld [vmem:[#allocation2 + $0x18] sm:$0xf]  ;;  %v153_v59 = vpop.permute.xlu0 %152  }
  0xa1   :  { %v307_v58 = vld [vmem:[#allocation2 + $0x58] sm:$0xf]  ;;  %v159_v60 = vpop.permute.xlu1 %158   ;;  %256 = vst [vmem:[#allocation0 + $0xc] sm:$0xf] %v251_v57  ;;  %156 = vst.msk [vmem:[#allocation2 + $0x23] sm:$0x1] %vm9_vm0, %v153_v59  }
  0xa2   :  { %312 = vst [vmem:[#allocation0 + $0x2c] sm:$0xf] %v307_v58  ;;  %162 = vst.msk [vmem:[#allocation2 + $0x28] sm:$0x1] %vm9_vm0, %v159_v60  }
  0xa4   :  { %v165_v61 = vpop.permute.xlu0 %164  }
  0xa5   :  { %v171_v62 = vpop.permute.xlu1 %170   ;;  %168 = vst.msk [vmem:[#allocation2 + $0x29] sm:$0x1] %vm9_vm0, %v165_v61  }
  0xa6   :  { %174 = vst.msk [vmem:[#allocation2 + $0x2a] sm:$0x1] %vm9_vm0, %v171_v62  }
  0xa8   :  { %v258_v63 = vld [vmem:[#allocation2 + $0x20] sm:$0xf]  ;;  %v177_v0 = vpop.permute.xlu0 %176  }
  0xa9   :  { %v183_v1 = vpop.permute.xlu1 %182   ;;  %263 = vst [vmem:[#allocation0 + $0x10] sm:$0xf] %v258_v63  ;;  %180 = vst.msk [vmem:[#allocation2 + $0x2b] sm:$0x1] %vm9_vm0, %v177_v0  }
  0xaa   :  { %186 = vst.msk [vmem:[#allocation2 + $0x30] sm:$0x1] %vm9_vm0, %v183_v1  }
  0xac   :  { %v189_v2 = vpop.permute.xlu0 %188  }
  0xad   :  { %v195_v3 = vpop.permute.xlu1 %194   ;;  %192 = vst.msk [vmem:[#allocation2 + $0x31] sm:$0x1] %vm9_vm0, %v189_v2  }
  0xae   :  { %198 = vst.msk [vmem:[#allocation2 + $0x32] sm:$0x1] %vm9_vm0, %v195_v3  }
  0xb0   :  { %v265_v4 = vld [vmem:[#allocation2 + $0x28] sm:$0xf]  ;;  %v201_v5 = vpop.permute.xlu0 %200  }
  0xb1   :  { %v207_v6 = vpop.permute.xlu1 %206   ;;  %270 = vst [vmem:[#allocation0 + $0x14] sm:$0xf] %v265_v4  ;;  %204 = vst.msk [vmem:[#allocation2 + $0x33] sm:$0x1] %vm9_vm0, %v201_v5  }
  0xb2   :  { %210 = vst.msk [vmem:[#allocation2 + $0x38] sm:$0x1] %vm9_vm0, %v207_v6  }
  0xb4   :  { %v213_v7 = vpop.permute.xlu0 %212  }
  0xb5   :  { %v219_v8 = vpop.permute.xlu1 %218   ;;  %216 = vst.msk [vmem:[#allocation2 + $0x39] sm:$0x1] %vm9_vm0, %v213_v7  }
  0xb6   :  { %222 = vst.msk [vmem:[#allocation2 + $0x3a] sm:$0x1] %vm9_vm0, %v219_v8  }
  0xb8   :  { %v272_v9 = vld [vmem:[#allocation2 + $0x30] sm:$0xf]  ;;  %v225_v10 = vpop.permute.xlu0 %224  }
  0xb9   :  { %277 = vst [vmem:[#allocation0 + $0x18] sm:$0xf] %v272_v9  ;;  %228 = vst.msk [vmem:[#allocation2 + $0x3b] sm:$0x1] %vm9_vm0, %v225_v10  }
  0xc0   :  { %v279_v11 = vld [vmem:[#allocation2 + $0x38] sm:$0xf] }
  0xc1   :  { %284 = vst [vmem:[#allocation0 + $0x1c] sm:$0xf] %v279_v11 }
  0xc2   :  { %376 = shalt.err (!%p373_p4)
}
  0xc3   :  { %320 = dma.vmem_to_hbm [thread:$0]  %s318_s9, 768, %s484_s1, [#allocation1]  }
  0xc4   :  { %385 = dma.done.wait [#allocation1], 768  }
  0xc5   :  { %386 = vsyncadd [#allocation1], 4294966528 }
  0xc6   :  { %322 = vsyncpa [#allocation1], 1 }

// kernel: forward.1
= control target key start
LH: loop header
LB: loop body
LE: loop exit
PB: predicated region body
PF: predicated region fallthrough
CT: control target
= control target key end

     0   :  { %vm122_vm0 = vcmask 523264   ;;  %s828_s1 = inlined_call_operand.vmem [shape: bf16[192,192], index: 1, kind: input, shape index: {}]   ;;  %s829_s0 = inlined_call_operand.vmem [shape: f32[8,192], index: 0, kind: input, shape index: {}]   ;;  %s830_s2 = inlined_call_operand.vmem [shape: bf16[192,192], index: 2, kind: input, shape index: {}]   ;;  %s831_s3 = inlined_call_operand.vmem [shape: f32[8,192], index: 3, kind: input, shape index: {}]   ;;  %s832_s4 = inlined_call_operand.vmem [shape: f32[8,192], index: 4, kind: output, shape index: {}]  }
   0x1   :  { %v57_v0 = vld [vmem:[%s828_s1 + $0x78] sm:$0xff]  ;;  %v56_v1 = vld [vmem:[%s828_s1 + $0x70] sm:$0xff]  ;;  %v55_v2 = vld [vmem:[%s828_s1 + $0x68] sm:$0xff] }
   0x2   :  { %v97_v3 = vunpack.c.h.bf16 %v57_v0  ;;  %v96_v4 = vunpack.c.l.bf16 %v57_v0  ;;  %v95_v5 = vunpack.c.h.bf16 %v56_v1  ;;  %v94_v6 = vunpack.c.l.bf16 %v56_v1  ;;  %v54_v7 = vld [vmem:[%s828_s1 + $0x60] sm:$0xff]  ;;  %v53_v10 = vld [vmem:[%s828_s1 + $0x58] sm:$0xff]  ;;  %v52_v13 = vld [vmem:[%s828_s1 + $0x50] sm:$0xff] }
   0x3   :  { %v93_v8 = vunpack.c.h.bf16 %v55_v2  ;;  %v92_v9 = vunpack.c.l.bf16 %v55_v2  ;;  %v91_v11 = vunpack.c.h.bf16 %v54_v7  ;;  %v90_v12 = vunpack.c.l.bf16 %v54_v7  ;;  %v51_v16 = vld [vmem:[%s828_s1 + $0x48] sm:$0xff]  ;;  %v50_v20 = vld [vmem:[%s828_s1 + $0x40] sm:$0xff]  ;;  %v49_v23 = vld [vmem:[%s828_s1 + $0x38] sm:$0xff] }
   0x4   :  { %126 = vmatprep.subr.mxu0 %v97_v3  ;;  %v89_v14 = vunpack.c.h.bf16 %v53_v10  ;;  %v88_v15 = vunpack.c.l.bf16 %v53_v10  ;;  %v18_v17 = vld [vmem:[%s829_s0 + $0x8] sm:$0xff]  ;;  %v87_v18 = vunpack.c.h.bf16 %v52_v13  ;;  %v86_v19 = vunpack.c.l.bf16 %v52_v13  ;;  %v48_v26 = vld [vmem:[%s828_s1 + $0x30] sm:$0xff]  ;;  %v46_v32 = vld [vmem:[%s828_s1 + $0x20] sm:$0xff] }
   0x5   :  { %127 = vmatpush1.msra.mxu0 %v96_v4  ;;  %535 = vmatprep.mubr.msk.f32.mxu0 %vm122_vm0, %v18_v17  ;;  %v85_v21 = vunpack.c.h.bf16 %v51_v16  ;;  %v84_v22 = vunpack.c.l.bf16 %v51_v16  ;;  %v83_v24 = vunpack.c.h.bf16 %v50_v20  ;;  %v82_v25 = vunpack.c.l.bf16 %v50_v20  ;;  %v47_v29 = vld [vmem:[%s828_s1 + $0x28] sm:$0xff]  ;;  %v45_v35 = vld [vmem:[%s828_s1 + $0x18] sm:$0xff]  ;;  %v44_v38 = vld [vmem:[%s828_s1 + $0x10] sm:$0xff] }
   0x6   :  { %128 = vmatprep.subr.mxu0 %v95_v5  ;;  %v81_v27 = vunpack.c.h.bf16 %v49_v23  ;;  %v80_v28 = vunpack.c.l.bf16 %v49_v23  ;;  %v79_v30 = vunpack.c.h.bf16 %v48_v26  ;;  %v78_v31 = vunpack.c.l.bf16 %v48_v26  ;;  %v43_v41 = vld [vmem:[%s828_s1 + $0x8] sm:$0xff]  ;;  %v42_v44 = vld [vmem:[%s828_s1] sm:$0xff]  ;;  %v65_v47 = vld [vmem:[%s828_s1 + $0xb8] sm:$0xff] }
   0x7   :  { %129 = vmatpush1.msra.mxu0 %v94_v6  ;;  %v77_v33 = vunpack.c.h.bf16 %v47_v29  ;;  %v76_v34 = vunpack.c.l.bf16 %v47_v29  ;;  %v75_v36 = vunpack.c.h.bf16 %v46_v32  ;;  %v74_v37 = vunpack.c.l.bf16 %v46_v32  ;;  %v64_v50 = vld [vmem:[%s828_s1 + $0xb0] sm:$0xff]  ;;  %v63_v53 = vld [vmem:[%s828_s1 + $0xa8] sm:$0xff]  ;;  %v62_v56 = vld [vmem:[%s828_s1 + $0xa0] sm:$0xff] }
   0x8   :  { %130 = vmatprep.subr.mxu0 %v93_v8  ;;  %v73_v39 = vunpack.c.h.bf16 %v45_v35  ;;  %v72_v40 = vunpack.c.l.bf16 %v45_v35  ;;  %v71_v42 = vunpack.c.h.bf16 %v44_v38  ;;  %v70_v43 = vunpack.c.l.bf16 %v44_v38  ;;  %v61_v59 = vld [vmem:[%s828_s1 + $0x98] sm:$0xff]  ;;  %v60_v62 = vld [vmem:[%s828_s1 + $0x90] sm:$0xff]  ;;  %v59_v1 = vld [vmem:[%s828_s1 + $0x88] sm:$0xff] }
   0x9   :  { %131 = vmatpush1.msra.mxu0 %v92_v9  ;;  %v69_v45 = vunpack.c.h.bf16 %v43_v41  ;;  %v68_v46 = vunpack.c.l.bf16 %v43_v41  ;;  %v67_v48 = vunpack.c.h.bf16 %v42_v44  ;;  %v66_v49 = vunpack.c.l.bf16 %v42_v44  ;;  %v58_v4 = vld [vmem:[%s828_s1 + $0x80] sm:$0xff]  ;;  %v300_v10 = vld [vmem:[%s830_s2 + $0x78] sm:$0xff]  ;;  %v295_v23 = vld [vmem:[%s830_s2 + $0x50] sm:$0xff] }
   0xa   :  { %132 = vmatprep.subr.mxu0 %v91_v11  ;;  %v113_v51 = vunpack.c.h.bf16 %v65_v47  ;;  %v112_v52 = vunpack.c.l.bf16 %v65_v47  ;;  %v111_v54 = vunpack.c.h.bf16 %v64_v50  ;;  %v110_v55 = vunpack.c.l.bf16 %v64_v50  ;;  %v17_v9 = vld [vmem:[%s829_s0] sm:$0xff]  ;;  %v299_v11 = vld [vmem:[%s830_s2 + $0x70] sm:$0xff]  ;;  %v296_v20 = vld [vmem:[%s830_s2 + $0x58] sm:$0xff] }
   0xb   :  { %133 = vmatpush1.msra.mxu0 %v90_v12  ;;  %v109_v57 = vunpack.c.h.bf16 %v63_v53  ;;  %v108_v58 = vunpack.c.l.bf16 %v63_v53  ;;  %v107_v60 = vunpack.c.h.bf16 %v62_v56  ;;  %v106_v61 = vunpack.c.l.bf16 %v62_v56  ;;  %v298_v12 = vld [vmem:[%s830_s2 + $0x68] sm:$0xff]  ;;  %v297_v17 = vld [vmem:[%s830_s2 + $0x60] sm:$0xff] }
   0xc   :  { %134 = vmatprep.subr.mxu0 %v89_v14  ;;  %v105_v63 = vunpack.c.h.bf16 %v61_v59  ;;  %v104_v0 = vunpack.c.l.bf16 %v61_v59  ;;  %v103_v2 = vunpack.c.h.bf16 %v60_v62  ;;  %v102_v3 = vunpack.c.l.bf16 %v60_v62 }
   0xd   :  { %135 = vmatpush1.msra.mxu0 %v88_v15  ;;  %v101_v5 = vunpack.c.h.bf16 %v59_v1  ;;  %v100_v6 = vunpack.c.l.bf16 %v59_v1  ;;  %v99_v7 = vunpack.c.h.bf16 %v58_v4  ;;  %v98_v8 = vunpack.c.l.bf16 %v58_v4 }
   0xe   :  { %136 = vmatprep.subr.mxu0 %v87_v18  ;;  %v340_v13 = vunpack.c.h.bf16 %v300_v10  ;;  %v339_v14 = vunpack.c.l.bf16 %v300_v10  ;;  %v338_v15 = vunpack.c.h.bf16 %v299_v11  ;;  %v337_v16 = vunpack.c.l.bf16 %v299_v11  ;;  %v286_v11 = vld [vmem:[%s830_s2 + $0x8] sm:$0xff] }
   0xf   :  { %137 = vmatpush1.msra.mxu0 %v86_v19  ;;  %v336_v18 = vunpack.c.h.bf16 %v298_v12  ;;  %v335_v19 = vunpack.c.l.bf16 %v298_v12  ;;  %v330_v26 = vunpack.c.h.bf16 %v295_v23  ;;  %v312_v12 = vunpack.c.h.bf16 %v286_v11 }
  0x10   :  { %138 = vmatprep.subr.mxu0 %v85_v21  ;;  %368 = vmatprep.subr.mxu1 %v340_v13  ;;  %v334_v21 = vunpack.c.h.bf16 %v297_v17  ;;  %v311_v13 = vunpack.c.l.bf16 %v286_v11 }
  0x11   :  { %139 = vmatpush1.msra.mxu0 %v84_v22  ;;  %369 = vmatpush1.msra.mxu1 %v339_v14  ;;  %v333_v22 = vunpack.c.l.bf16 %v297_v17  ;;  %v285_v14 = vld [vmem:[%s830_s2] sm:$0xff] }
  0x12   :  { %140 = vmatprep.subr.mxu0 %v83_v24  ;;  %370 = vmatprep.subr.mxu1 %v338_v15  ;;  %v332_v24 = vunpack.c.h.bf16 %v296_v20  ;;  %v308_v15 = vld [vmem:[%s830_s2 + $0xb8] sm:$0xff]  ;;  %v309_v17 = vunpack.c.l.bf16 %v285_v14 }
  0x13   :  { %141 = vmatpush1.msra.mxu0 %v82_v25  ;;  %371 = vmatpush1.msra.mxu1 %v337_v16  ;;  %v331_v25 = vunpack.c.l.bf16 %v296_v20  ;;  %v310_v16 = vunpack.c.h.bf16 %v285_v14  ;;  %v355_v20 = vunpack.c.l.bf16 %v308_v15 }
  0x14   :  { %142 = vmatprep.subr.mxu0 %v81_v27  ;;  %372 = vmatprep.subr.mxu1 %v336_v18  ;;  %v329_v27 = vunpack.c.l.bf16 %v295_v23  ;;  %v307_v18 = vld [vmem:[%s830_s2 + $0xb0] sm:$0xff] }
  0x15   :  { %143 = vmatpush1.msra.mxu0 %v80_v28  ;;  %373 = vmatpush1.msra.mxu1 %v335_v19  ;;  %v21_v28 = vlaneseq  ;;  %v356_v19 = vunpack.c.h.bf16 %v308_v15  ;;  %v353_v23 = vunpack.c.l.bf16 %v307_v18 }
  0x16   :  { %144 = vmatprep.subr.mxu0 %v79_v30  ;;  %374 = vmatprep.subr.mxu1 %v334_v21  ;;  %v306_v21 = vld [vmem:[%s830_s2 + $0xa8] sm:$0xff] }
  0x17   :  { %145 = vmatpush1.msra.mxu0 %v78_v31  ;;  %375 = vmatpush1.msra.mxu1 %v333_v22  ;;  %v671_v29 = vshrl.u32 %v21_v28, 7  ;;  %v677_v31 = vld [vmem:[%s831_s3] sm:$0xff]  ;;  %v679_v32 = vand.u32 127, %v21_v28  ;;  %v354_v22 = vunpack.c.h.bf16 %v307_v18 }
  0x18   :  { %146 = vmatprep.subr.mxu0 %v77_v33  ;;  %376 = vmatprep.subr.mxu1 %v332_v24  ;;  %v684_v33 = vld [vmem:[%s831_s3 + $0x8] sm:$0xff]  ;;  %v305_v24 = vld [vmem:[%s830_s2 + $0xa0] sm:$0xff] }
  0x19   :  { %147 = vmatpush1.msra.mxu0 %v76_v34  ;;  %377 = vmatpush1.msra.mxu1 %v331_v25  ;;  %v116_v30 = vsub.s32 0, %v671_v29  ;;  %v688_v35 = vadd.s32 128, %v679_v32  ;;  %vm30_vm1 = vcmp.ge.s32.totalorder %v679_v32, 64  ;;  %vm26_vm2 = vcmp.lt.s32.totalorder %v679_v32, 64 }
  0x1a   :  { %148 = vmatprep.subr.mxu0 %v75_v36  ;;  %378 = vmatprep.subr.mxu1 %v330_v26  ;;  %v352_v25 = vunpack.c.h.bf16 %v306_v21  ;;  %v351_v26 = vunpack.c.l.bf16 %v306_v21  ;;  %v350_v28 = vunpack.c.h.bf16 %v305_v24 }
  0x1b   :  { %149 = vmatpush1.msra.mxu0 %v74_v37  ;;  %379 = vmatpush1.msra.mxu1 %v329_v27  ;;  %v117_v34 = vrot.slane %v677_v31, %v116_v30  ;;  %v121_v36 = vrot.slane %v684_v33, %v116_v30  ;;  %vm39_vm3 = vcmp.lt.s32.totalorder %v688_v35, 192  ;;  %v304_v27 = vld [vmem:[%s830_s2 + $0x98] sm:$0xff]  ;;  %v349_v30 = vunpack.c.l.bf16 %v305_v24 }
  0x1c   :  { %150 = vmatprep.subr.mxu0 %v73_v39 }
  0x1d   :  { %151 = vmatpush1.msra.mxu0 %v72_v40 }
  0x1e   :  { %152 = vmatprep.subr.mxu0 %v71_v42 }
  0x1f   :  { %153 = vmatpush1.msra.mxu0 %v70_v43 }
  0x20   :  { %154 = vmatprep.subr.mxu0 %v69_v45 }
  0x21   :  { %155 = vmatpush1.msra.mxu0 %v68_v46 }
  0x22   :  { %156 = vmatprep.subr.mxu0 %v67_v48 }
  0x23   :  { %157 = vmatpush1.msra.mxu0 %v66_v49 }
  0x24   :  { %174 = vmatprep.subr.mxu0 %v113_v51  ;;  %v294_v51 = vld [vmem:[%s830_s2 + $0x48] sm:$0xff] }
  0x25   :  { %175 = vmatpush2.msra.mxu0 %v112_v52  ;;  %v328_v52 = vunpack.c.h.bf16 %v294_v51  ;;  %v327_v53 = vunpack.c.l.bf16 %v294_v51 }
  0x26   :  { %176 = vmatprep.subr.mxu0 %v111_v54  ;;  %v293_v54 = vld [vmem:[%s830_s2 + $0x40] sm:$0xff] }
  0x27   :  { %177 = vmatpush2.msra.mxu0 %v110_v55  ;;  %380 = vmatprep.subr.mxu1 %v328_v52  ;;  %v326_v55 = vunpack.c.h.bf16 %v293_v54  ;;  %v325_v56 = vunpack.c.l.bf16 %v293_v54 }
  0x28   :  { %178 = vmatprep.subr.mxu0 %v109_v57  ;;  %381 = vmatpush1.msra.mxu1 %v327_v53  ;;  %v292_v57 = vld [vmem:[%s830_s2 + $0x38] sm:$0xff] }
  0x29   :  { %179 = vmatpush2.msra.mxu0 %v108_v58  ;;  %382 = vmatprep.subr.mxu1 %v326_v55  ;;  %v324_v58 = vunpack.c.h.bf16 %v292_v57  ;;  %v323_v59 = vunpack.c.l.bf16 %v292_v57 }
  0x2a   :  { %180 = vmatprep.subr.mxu0 %v107_v60  ;;  %383 = vmatpush1.msra.mxu1 %v325_v56  ;;  %v291_v60 = vld [vmem:[%s830_s2 + $0x30] sm:$0xff] }
  0x2b   :  { %181 = vmatpush2.msra.mxu0 %v106_v61  ;;  %384 = vmatprep.subr.mxu1 %v324_v58  ;;  %v322_v61 = vunpack.c.h.bf16 %v291_v60  ;;  %v321_v62 = vunpack.c.l.bf16 %v291_v60 }
  0x2c   :  { %182 = vmatprep.subr.mxu0 %v105_v63  ;;  %385 = vmatpush1.msra.mxu1 %v323_v59  ;;  %v290_v63 = vld [vmem:[%s830_s2 + $0x28] sm:$0xff] }
  0x2d   :  { %183 = vmatpush2.msra.mxu0 %v104_v0  ;;  %386 = vmatprep.subr.mxu1 %v322_v61  ;;  %v320_v0 = vunpack.c.h.bf16 %v290_v63  ;;  %v319_v1 = vunpack.c.l.bf16 %v290_v63 }
  0x2e   :  { %184 = vmatprep.subr.mxu0 %v103_v2  ;;  %387 = vmatpush1.msra.mxu1 %v321_v62  ;;  %v289_v2 = vld [vmem:[%s830_s2 + $0x20] sm:$0xff] }
  0x2f   :  { %185 = vmatpush2.msra.mxu0 %v102_v3  ;;  %388 = vmatprep.subr.mxu1 %v320_v0  ;;  %v318_v3 = vunpack.c.h.bf16 %v289_v2  ;;  %v317_v4 = vunpack.c.l.bf16 %v289_v2 }
  0x30   :  { %186 = vmatprep.subr.mxu0 %v101_v5  ;;  %389 = vmatpush1.msra.mxu1 %v319_v1  ;;  %v288_v5 = vld [vmem:[%s830_s2 + $0x18] sm:$0xff] }
  0x31   :  { %187 = vmatpush2.msra.mxu0 %v100_v6  ;;  %390 = vmatprep.subr.mxu1 %v318_v3  ;;  %v316_v6 = vunpack.c.h.bf16 %v288_v5 }
  0x32   :  { %188 = vmatprep.subr.mxu0 %v99_v7  ;;  %391 = vmatpush1.msra.mxu1 %v317_v4  ;;  %v315_v7 = vunpack.c.l.bf16 %v288_v5 }
  0x33   :  { %189 = vmatpush2.msra.mxu0 %v98_v8  ;;  %v287_v8 = vld [vmem:[%s830_s2 + $0x10] sm:$0xff]  ;;  %392 = vmatprep.subr.mxu1 %v316_v6  ;;  %v267_v6 = vsub.s32 1, %v671_v29 }
  0x34   :  { %191 = vmatmul.mubr.f32.vlgmr.msra.gmra.mxu0 %v17_v9  ;;  %v314_v9 = vunpack.c.h.bf16 %v287_v8  ;;  %393 = vmatpush1.msra.mxu1 %v315_v7  ;;  %v313_v10 = vunpack.c.l.bf16 %v287_v8  ;;  %v277_v7 = vsub.s32 2, %v671_v29 }
  0x35   :  { %v272_v11 = vrot.slane %v684_v33, %v267_v6  ;;  %v268_v18 = vrot.slane %v677_v31, %v267_v6  ;;  %v519_v6 = vsub.s32 5, %v671_v29 }
  0x36   :  { %394 = vmatprep.subr.mxu1 %v314_v9 }
  0x37   :  { %395 = vmatpush1.msra.mxu1 %v313_v10 }
  0x38   :  { %396 = vmatprep.subr.mxu1 %v312_v12 }
  0x39   :  { %397 = vmatpush1.msra.mxu1 %v311_v13  ;;  %v282_v13 = vrot.slane %v684_v33, %v277_v7 }
  0x3a   :  { %398 = vmatprep.subr.mxu1 %v310_v16 }
  0x3b   :  { %399 = vmatpush1.msra.mxu1 %v309_v17 }
  0x3c   :  { %416 = vmatprep.subr.mxu1 %v356_v19 }
  0x3d   :  { %417 = vmatpush2.msra.mxu1 %v355_v20 }
  0x3e   :  { %418 = vmatprep.subr.mxu1 %v354_v22 }
  0x3f   :  { %419 = vmatpush2.msra.mxu1 %v353_v23 }
  0x40   :  { %420 = vmatprep.subr.mxu1 %v352_v25 }
  0x41   :  { %421 = vmatpush2.msra.mxu1 %v351_v26 }
  0x42   :  { %422 = vmatprep.subr.mxu1 %v350_v28 }
  0x43   :  { %423 = vmatpush2.msra.mxu1 %v349_v30 }
  0xf4   :  { %v192_v37 = vpop.f32.mrf.mxu0 }
  0xf5   :  { %v693_v38 = vadd.f32 %v192_v37, %v117_v34  ;;  %v303_v34 = vld [vmem:[%s830_s2 + $0x90] sm:$0xff]  ;;  %v347_v37 = vunpack.c.l.bf16 %v304_v27 }
  0xf6   :  { %v194_v39 = vpop.f32.mrf.mxu0 }
  0xf7   :  { %v696_v40 = vadd.f32 %v194_v39, %v121_v36  ;;  %v217_v41 = vsel %vm30_vm1, %v693_v38, 0.0  ;;  %v197_v42 = vsel %vm26_vm2, %v693_v38, 0.0  ;;  %v204_v43 = vmul.f32 %v693_v38, %v693_v38  ;;  %v302_v39 = vld [vmem:[%s830_s2 + $0x88] sm:$0xff] }
  0xf8   :  { %221 = vadd.xlane.f32.xlu0 %v217_v41  ;;  %201 = vadd.xlane.f32.xlu1 %v197_v42  ;;  %v348_v36 = vunpack.c.h.bf16 %v304_v27  ;;  %v346_v41 = vunpack.c.h.bf16 %v303_v34  ;;  %v345_v42 = vunpack.c.l.bf16 %v303_v34 }
  0xf9   :  { %v236_v44 = vsel %vm39_vm3, %v696_v40, 0.0  ;;  %v205_v45 = vmul.f32 %v696_v40, %v696_v40  ;;  %v224_v47 = vsel %vm30_vm1, %v204_v43, 0.0  ;;  %v206_v50 = vsel %vm26_vm2, %v204_v43, 0.0  ;;  %v301_v43 = vld [vmem:[%s830_s2 + $0x80] sm:$0xff] }
  0xfa   :  { %v237_v46 = vsel %vm122_vm0, %v236_v44, 0.0  ;;  %424 = vmatprep.subr.mxu1 %v348_v36  ;;  %v344_v44 = vunpack.c.h.bf16 %v302_v39 }
  0xfb   :  { %v243_v48 = vsel %vm39_vm3, %v205_v45, 0.0  ;;  %425 = vmatpush2.msra.mxu1 %v347_v37  ;;  %v343_v45 = vunpack.c.l.bf16 %v302_v39 }
  0xfc   :  { %239 = vadd.xlane.f32.xlu0 %v237_v46  ;;  %228 = vadd.xlane.f32.xlu1 %v224_v47  ;;  %v244_v49 = vsel %vm122_vm0, %v243_v48, 0.0  ;;  %v342_v46 = vunpack.c.h.bf16 %v301_v43  ;;  %v341_v47 = vunpack.c.l.bf16 %v301_v43 }
  0xfd   :  { %426 = vmatprep.subr.mxu1 %v346_v41 }
  0xfe   :  { %427 = vmatpush2.msra.mxu1 %v345_v42 }
  0xff   :  { %428 = vmatprep.subr.mxu1 %v344_v44 }
 0x100   :  { %246 = vadd.xlane.f32.xlu0 %v244_v49  ;;  %210 = vadd.xlane.f32.xlu1 %v206_v50 }
 0x101   :  { %429 = vmatpush2.msra.mxu1 %v343_v45 }
 0x102   :  { %430 = vmatprep.subr.mxu1 %v342_v46 }
 0x103   :  { %431 = vmatpush2.msra.mxu1 %v341_v47 }
 0x181   :  { %v222_v48 = vpop.xlane.xlu0 %221  ;;  %v202_v49 = vpop.xlane.xlu1 %201 }
 0x182   :  { %v223_v50 = vmul.f32 0.015625, %v222_v48  ;;  %v203_v54 = vmul.f32 0.015625, %v202_v49 }
 0x184   :  { %v231_v53 = vmul.f32 %v223_v50, %v223_v50  ;;  %v213_v60 = vmul.f32 %v203_v54, %v203_v54 }
 0x185   :  { %v240_v51 = vpop.xlane.xlu0 %239  ;;  %v229_v52 = vpop.xlane.xlu1 %228 }
 0x186   :  { %v241_v55 = vmul.f32 0.015625, %v240_v51  ;;  %v230_v56 = vmul.f32 0.015625, %v229_v52 }
 0x188   :  { %v232_v57 = vsub.f32 %v230_v56, %v231_v53  ;;  %v249_v61 = vmul.f32 %v241_v55, %v241_v55  ;;  %v253_v5 = vsel %vm30_vm1, %v223_v50, %v241_v55  ;;  %v262_v10 = vsub.f32 %v696_v40, %v241_v55 }
 0x189   :  { %v247_v58 = vpop.xlane.xlu0 %246  ;;  %v211_v59 = vpop.xlane.xlu1 %210  ;;  %v255_v8 = vsel %vm26_vm2, %v203_v54, %v253_v5  ;;  %v278_v40 = vrot.slane %v677_v31, %v277_v7 }
 0x18a   :  { %v248_v62 = vmul.f32 0.015625, %v247_v58  ;;  %v212_v63 = vmul.f32 0.015625, %v211_v59  ;;  %v233_v0 = vadd.f32 1e-05, %v232_v57  ;;  %v261_v15 = vsub.f32 %v693_v38, %v255_v8 }
 0x18b   :  { %v359_v38 = vsub.s32 3, %v671_v29 }
 0x18c   :  { %v250_v1 = vsub.f32 %v248_v62, %v249_v61  ;;  %v214_v2 = vsub.f32 %v212_v63, %v213_v60  ;;  %537 = vrsqrt.f32 %v233_v0 }
 0x18d   :  { %v360_v25 = vrot.slane %v677_v31, %v359_v38  ;;  %v364_v26 = vrot.slane %v684_v33, %v359_v38 }
 0x18e   :  { %v251_v3 = vadd.f32 1e-05, %v250_v1  ;;  %v215_v4 = vadd.f32 1e-05, %v214_v2 }
 0x190   :  { %539 = vrsqrt.f32 %v251_v3 }
 0x191   :  { %541 = vrsqrt.f32 %v215_v4  ;;  %v509_v4 = vsub.s32 4, %v671_v29 }
 0x199   :  { %v538_v9 = vpop.eup %537 }
 0x19d   :  { %v540_v12 = vpop.eup %539 }
 0x19e   :  { %v542_v14 = vpop.eup %541  ;;  %v264_v16 = vmul.f32 %v540_v12, %v262_v10  ;;  %v257_v17 = vsel %vm30_vm1, %v538_v9, %v540_v12  ;;  %v514_v9 = vrot.slane %v684_v33, %v509_v4  ;;  %v510_v12 = vrot.slane %v677_v31, %v509_v4 }
 0x19f   :  { %v259_v19 = vsel %vm26_vm2, %v542_v14, %v257_v17  ;;  %v524_v14 = vrot.slane %v684_v33, %v519_v6 }
 0x1a0   :  { %v274_v20 = vmul.f32 %v272_v11, %v264_v16  ;;  %v263_v21 = vmul.f32 %v261_v15, %v259_v19 }
 0x1a2   :  { %v284_v22 = vadd.f32 %v282_v13, %v274_v20  ;;  %v273_v23 = vmul.f32 %v268_v18, %v263_v21  ;;  %v520_v18 = vrot.slane %v677_v31, %v519_v6 }
 0x1a4   :  { %536 = vmatprep.mubr.msk.f32.mxu1 %vm122_vm0, %v284_v22  ;;  %v283_v24 = vadd.f32 %v278_v40, %v273_v23 }
 0x1a6   :  { %433 = vmatmul.mubr.f32.vlgmr.msra.gmra.mxu1 %v283_v24 }
 0x266   :  { %v434_v27 = vpop.f32.mrf.mxu1 }
 0x267   :  { %v435_v28 = vadd.f32 %v434_v27, %v360_v25 }
 0x268   :  { %v436_v30 = vpop.f32.mrf.mxu1 }
 0x269   :  { %v437_v34 = vadd.f32 %v436_v30, %v364_v26  ;;  %v459_v36 = vsel %vm30_vm1, %v435_v28, 0.0  ;;  %v446_v37 = vmul.f32 %v435_v28, %v435_v28  ;;  %v439_v43 = vsel %vm26_vm2, %v435_v28, 0.0 }
 0x26a   :  { %463 = vadd.xlane.f32.xlu0 %v459_v36 }
 0x26b   :  { %v466_v39 = vsel %vm30_vm1, %v446_v37, 0.0  ;;  %v447_v41 = vmul.f32 %v437_v34, %v437_v34  ;;  %v478_v42 = vsel %vm39_vm3, %v437_v34, 0.0  ;;  %v448_v47 = vsel %vm26_vm2, %v446_v37, 0.0 }
 0x26c   :  { %470 = vadd.xlane.f32.xlu1 %v466_v39  ;;  %v479_v45 = vsel %vm122_vm0, %v478_v42, 0.0 }
 0x26d   :  { %v485_v44 = vsel %vm39_vm3, %v447_v41, 0.0 }
 0x26e   :  { %443 = vadd.xlane.f32.xlu0 %v439_v43  ;;  %v486_v46 = vsel %vm122_vm0, %v485_v44, 0.0 }
 0x270   :  { %481 = vadd.xlane.f32.xlu1 %v479_v45 }
 0x272   :  { %488 = vadd.xlane.f32.xlu0 %v486_v46 }
 0x274   :  { %452 = vadd.xlane.f32.xlu1 %v448_v47 }
 0x2f3   :  { %v464_v48 = vpop.xlane.xlu0 %463 }
 0x2f4   :  { %v465_v49 = vmul.f32 0.015625, %v464_v48 }
 0x2f5   :  { %v471_v50 = vpop.xlane.xlu1 %470 }
 0x2f6   :  { %v473_v51 = vmul.f32 %v465_v49, %v465_v49  ;;  %v472_v52 = vmul.f32 0.015625, %v471_v50 }
 0x2f7   :  { %v444_v53 = vpop.xlane.xlu0 %443 }
 0x2f8   :  { %v474_v55 = vsub.f32 %v472_v52, %v473_v51  ;;  %v445_v35 = vmul.f32 0.015625, %v444_v53 }
 0x2f9   :  { %v482_v54 = vpop.xlane.xlu1 %481 }
 0x2fa   :  { %v483_v56 = vmul.f32 0.015625, %v482_v54  ;;  %v475_v61 = vadd.f32 1e-05, %v474_v55  ;;  %v455_v62 = vmul.f32 %v445_v35, %v445_v35 }
 0x2fb   :  { %v489_v57 = vpop.xlane.xlu0 %488 }
 0x2fc   :  { %v491_v58 = vmul.f32 %v483_v56, %v483_v56  ;;  %v490_v59 = vmul.f32 0.015625, %v489_v57  ;;  %543 = vrsqrt.f32 %v475_v61  ;;  %v495_v5 = vsel %vm30_vm1, %v465_v49, %v483_v56 }
 0x2fd   :  { %v453_v60 = vpop.xlane.xlu1 %452  ;;  %v497_v7 = vsel %vm26_vm2, %v445_v35, %v495_v5  ;;  %v504_v10 = vsub.f32 %v437_v34, %v483_v56 }
 0x2fe   :  { %v454_v63 = vmul.f32 0.015625, %v453_v60  ;;  %v492_v0 = vsub.f32 %v490_v59, %v491_v58  ;;  %v503_v15 = vsub.f32 %v435_v28, %v497_v7 }
 0x300   :  { %v456_v1 = vsub.f32 %v454_v63, %v455_v62  ;;  %v493_v2 = vadd.f32 1e-05, %v492_v0 }
 0x302   :  { %v457_v3 = vadd.f32 1e-05, %v456_v1  ;;  %545 = vrsqrt.f32 %v493_v2 }
 0x304   :  { %547 = vrsqrt.f32 %v457_v3 }
 0x309   :  { %v544_v8 = vpop.eup %543 }
 0x30f   :  { %v546_v11 = vpop.eup %545 }
 0x310   :  { %v499_v16 = vsel %vm30_vm1, %v544_v8, %v546_v11  ;;  %v506_v17 = vmul.f32 %v546_v11, %v504_v10 }
 0x311   :  { %v548_v13 = vpop.eup %547 }
 0x312   :  { %v501_v29 = vsel %vm26_vm2, %v548_v13, %v499_v16  ;;  %v516_v19 = vmul.f32 %v514_v9, %v506_v17 }
 0x313   :  { %v505_v20 = vmul.f32 %v503_v15, %v501_v29 }
 0x314   :  { %v526_v21 = vadd.f32 %v524_v14, %v516_v19 }
 0x315   :  { %v515_v40 = vmul.f32 %v510_v12, %v505_v20 }
 0x316   :  { %v528_v22 = vmax.f32 %v526_v21, 0.0 }
 0x317   :  { %v525_v23 = vadd.f32 %v520_v18, %v515_v40 }
 0x318   :  { %530 = vst.msk [vmem:[%s832_s4 + $0x8] sm:$0xff] %vm122_vm0, %v528_v22 }
 0x319   :  { %v527_v33 = vmax.f32 %v525_v23, 0.0 }
 0x31b   :  { %529 = vst [vmem:[%s832_s4] sm:$0xff] %v527_v33 }

</bundles_post_ra>
